<compile_context>
chip_gen: v7x
topology: tpu7x:2x2x1
jax: 0.10.0
libtpu: 0.0.40
codegen_flags: <defaults>
</compile_context>

<pallas_src>
import functools

import jax
import jax.numpy as jnp
from jax.experimental import pallas as pl
from jax.experimental.pallas import tpu as pltpu


def _round_up(a, b):
    return (a + b - 1) // b * b


def _dice_partial_kernel(x_ref, t_ref, inter_ref, denom_ref,
                         inter_acc, denom_acc, *, td, d, mask_last):
    """Accumulate per-row sum(x*t) and sum(x)+sum(t) over one (tn, td) feature
    tile of this split; emit the split's partial row sums on its last tile."""
    s = pl.program_id(0)          # feature-split index (megacore axis)
    j = pl.program_id(2)          # feature tile within this split
    n_j = pl.num_programs(2)

    @pl.when(j == 0)
    def _init():
        inter_acc[...] = jnp.zeros_like(inter_acc)
        denom_acc[...] = jnp.zeros_like(denom_acc)

    # Cast in-kernel: HBM traffic stays at the native input width.
    x = x_ref[...].astype(jnp.float32)
    t = t_ref[...].astype(jnp.float32)
    prod = x * t
    ssum = x + t

    if mask_last:
        # Ragged last feature tile: zero out-of-range lanes with cheap VPU
        # selects instead of materializing padded copies of the inputs in HBM.
        lane = jax.lax.broadcasted_iota(jnp.int32, prod.shape, 1)
        col = (s * n_j + j) * td + lane
        valid = col < d
        prod = jnp.where(valid, prod, 0.0)
        ssum = jnp.where(valid, ssum, 0.0)

    inter_acc[...] += jnp.sum(prod, axis=1, keepdims=True)
    denom_acc[...] += jnp.sum(ssum, axis=1, keepdims=True)

    @pl.when(j == n_j - 1)
    def _finalize():
        inter_ref[...] = inter_acc[...]
        denom_ref[...] = denom_acc[...]


def _select_tiling(N, D, target_block_bytes):
    # Row tile: one full-batch block for typical segmentation batches;
    # otherwise 256-row blocks (multiple of the min sublane tile for
    # f32/bf16/int8, so native-dtype inputs stay legal).
    tn = N if N <= 256 else 256
    n_row_tiles = pl.cdiv(N, tn)

    # Feature tile: largest lane-dense (multiple-of-128) width whose
    # VMEM-resident block (sublane-padded, f32-equivalent upper bound) stays
    # under target_block_bytes per operand.
    padded_tn = _round_up(tn, 8)
    td_max = max(128, (target_block_bytes // (padded_tn * 4)) // 128 * 128)
    td_max = min(td_max, _round_up(D, 128))

    # Megacore split of the reduction axis: only when the row axis has a
    # single block.  Pick the largest td giving an even tile count so both
    # halves are identical (no phantom tiles / clamped index maps needed).
    splits, td = 1, td_max
    if n_row_tiles == 1:
        cand = td_max
        while cand >= 128:
            t_tiles = pl.cdiv(D, cand)
            if t_tiles >= 2 and t_tiles % 2 == 0:
                splits, td = 2, cand
                break
            cand -= 128
    tiles_per_split = pl.cdiv(D, td) // splits
    return tn, n_row_tiles, td, splits, tiles_per_split


def dice_loss(inputs, targets, smooth=1.0, target_block_bytes=4 << 20):
    """Pallas TPU DiceLoss forward. inputs/targets: (N, ...) arrays (any dtype)."""
    N = inputs.shape[0]
    x = inputs.reshape(N, -1)
    t = targets.reshape(N, -1)
    D = x.shape[1]

    tn, n_row_tiles, td, splits, tiles_per_split = _select_tiling(
        N, D, target_block_bytes)
    mask_last = (D % td) != 0

    grid = (splits, n_row_tiles, tiles_per_split)
    kernel = functools.partial(_dice_partial_kernel, td=td, d=D,
                               mask_last=mask_last)

    def in_map(s, i, j):
        return (i, s * tiles_per_split + j)

    in_spec = pl.BlockSpec((tn, td), in_map)
    out_spec = pl.BlockSpec((None, tn, 1), lambda s, i, j: (s, i, 0))

    # Scoped-VMEM budget: 2 inputs x 2 pipeline buffers of a sublane-padded
    # block, plus headroom; >= 32 MiB so v5e's 16 MiB default doesn't bite,
    # <= 60 MiB to stay inside v7x's 64 MiB physical VMEM.
    blk_vmem = _round_up(tn, 8) * td * 4
    vmem_limit = int(min(max(32 << 20, 4 * blk_vmem + (8 << 20)), 60 << 20))

    inter_p, denom_p = pl.pallas_call(
        kernel,
        out_shape=(
            jax.ShapeDtypeStruct((splits, N, 1), jnp.float32),
            jax.ShapeDtypeStruct((splits, N, 1), jnp.float32),
        ),
        grid_spec=pltpu.PrefetchScalarGridSpec(
            num_scalar_prefetch=0,
            grid=grid,
            in_specs=[in_spec, in_spec],
            out_specs=[out_spec, out_spec],
            scratch_shapes=[
                pltpu.VMEM((tn, 1), jnp.float32),
                pltpu.VMEM((tn, 1), jnp.float32),
            ],
        ),
        compiler_params=pltpu.CompilerParams(
            dimension_semantics=("parallel", "parallel", "arbitrary"),
            vmem_limit_bytes=vmem_limit,
        ),
        cost_estimate=pl.CostEstimate(
            flops=4 * N * D,
            transcendentals=0,
            bytes_accessed=N * D * (x.dtype.itemsize + t.dtype.itemsize)
            + 2 * splits * N * 4,
        ),
    )(x, t)

    # Tiny combine over splits + dice division + mean (O(N) work) in the wrapper.
    inter = jnp.sum(inter_p[:, :, 0], axis=0)
    denom = jnp.sum(denom_p[:, :, 0], axis=0)
    dice = (2.0 * inter + smooth) / (denom + smooth)
    return 1.0 - jnp.sum(dice) / N


def reference_dice_loss(inputs, targets, smooth=1.0):
    """Pure-JAX reference matching the PyTorch DiceLoss.forward."""
    N = targets.shape[0]
    xf = inputs.reshape(N, -1).astype(jnp.float32)
    tf = targets.reshape(N, -1).astype(jnp.float32)
    inter = (xf * tf).sum(1)
    loss = (2.0 * inter + smooth) / (xf.sum(1) + tf.sum(1) + smooth)
    return 1.0 - loss.sum() / N


if __name__ == "__main__":
    key = jax.random.PRNGKey(0)
    k_in, k_tg = jax.random.split(key)

    # Small segmentation-style shapes: (batch=2, channels=4, H=16, W=16).
    inp = jax.nn.sigmoid(jax.random.normal(k_in, (2, 4, 16, 16), jnp.float32))
    tgt = (jax.random.uniform(k_tg, (2, 4, 16, 16), jnp.float32) > 0.5).astype(jnp.float32)

    out = dice_loss(inp, tgt, smooth=1.0)
    out = jax.block_until_ready(out)

    ref = reference_dice_loss(inp, tgt, smooth=1.0)
    assert out.shape == ()
    assert jnp.allclose(out, ref, atol=1e-5, rtol=1e-5), (out, ref)

    print("KERNEL_OK")
</pallas_src>

<mosaic_0001>
module attributes {stable_mosaic.version = 11 : i64} {
  func.func @_dice_partial_kernel(%arg0: i32, %arg1: i32, %arg2: i32, %arg3: memref<2x896xf32, #tpu.memory_space<vmem>>, %arg4: memref<2x896xf32, #tpu.memory_space<vmem>>, %arg5: memref<1x2x1xf32, #tpu.memory_space<vmem>>, %arg6: memref<1x2x1xf32, #tpu.memory_space<vmem>>, %arg7: memref<2x1xf32, #tpu.memory_space<vmem>>, %arg8: memref<2x1xf32, #tpu.memory_space<vmem>>) attributes {dimension_semantics = [#tpu.dimension_semantics<parallel>, #tpu.dimension_semantics<parallel>, #tpu.dimension_semantics<arbitrary>], iteration_bounds = array<i64: 2, 1, 1>, scalar_prefetch = 0 : i64, scratch_operands = 2 : i64, tpu.core_type = #tpu.core_type<tc>, window_params = [{transform_indices = @transform_0, window_bounds = array<i64: 2, 896>}, {transform_indices = @transform_1, window_bounds = array<i64: 2, 896>}, {transform_indices = @transform_2, window_bounds = array<i64: 1, 2, 1>}, {transform_indices = @transform_3, window_bounds = array<i64: 1, 2, 1>}]} {
    %c0_i32 = arith.constant 0 : i32
    %0 = arith.cmpi eq, %arg2, %c0_i32 : i32
    %1 = arith.extui %0 : i1 to i32
    %c0_i32_0 = arith.constant 0 : i32
    %2 = arith.cmpi ne, %1, %c0_i32_0 : i32
    scf.if %2 {
      %cst_17 = arith.constant 0.000000e+00 : f32
      %32 = vector.broadcast %cst_17 : f32 to vector<2x1xf32>
      %c0_18 = arith.constant 0 : index
      %c0_19 = arith.constant 0 : index
      %33 = vector.load %arg7[%c0_18, %c0_19] : memref<2x1xf32, #tpu.memory_space<vmem>>, vector<2x1xf32>
      tpu.vector_store %arg7[%c0_18, %c0_19], %32 {strides = array<i32>} : memref<2x1xf32, #tpu.memory_space<vmem>>, vector<2x1xf32>,
      %cst_20 = arith.constant 0.000000e+00 : f32
      %34 = vector.broadcast %cst_20 : f32 to vector<2x1xf32>
      %c0_21 = arith.constant 0 : index
      %c0_22 = arith.constant 0 : index
      %35 = vector.load %arg8[%c0_21, %c0_22] : memref<2x1xf32, #tpu.memory_space<vmem>>, vector<2x1xf32>
      tpu.vector_store %arg8[%c0_21, %c0_22], %34 {strides = array<i32>} : memref<2x1xf32, #tpu.memory_space<vmem>>, vector<2x1xf32>,
    } else {
    }
    %c0 = arith.constant 0 : index
    %c0_1 = arith.constant 0 : index
    %3 = vector.load %arg3[%c0, %c0_1] : memref<2x896xf32, #tpu.memory_space<vmem>>, vector<2x896xf32>
    %c0_2 = arith.constant 0 : index
    %c0_3 = arith.constant 0 : index
    %4 = vector.load %arg4[%c0_2, %c0_3] : memref<2x896xf32, #tpu.memory_space<vmem>>, vector<2x896xf32>
    %5 = arith.mulf %3, %4 : vector<2x896xf32>
    %6 = arith.addf %3, %4 : vector<2x896xf32>
    %7 = tpu.iota {dimensions = array<i32: 1>} : vector<2x896xi32>
    %c1_i32 = arith.constant 1 : i32
    %8 = arith.muli %arg0, %c1_i32 : i32
    %9 = arith.addi %8, %arg2 : i32
    %c896_i32 = arith.constant 896 : i32
    %10 = arith.muli %9, %c896_i32 : i32
    %11 = vector.broadcast %10 : i32 to vector<2x896xi32>
    %12 = arith.addi %11, %7 : vector<2x896xi32>
    %c1024_i32 = arith.constant 1024 : i32
    %13 = vector.broadcast %c1024_i32 : i32 to vector<2x896xi32>
    %14 = arith.cmpi slt, %12, %13 : vector<2x896xi32>
    %cst = arith.constant 0.000000e+00 : f32
    %15 = vector.broadcast %cst : f32 to vector<2x896xf32>
    %16 = arith.select %14, %5, %15 : vector<2x896xi1>, vector<2x896xf32>
    %cst_4 = arith.constant 0.000000e+00 : f32
    %17 = vector.broadcast %cst_4 : f32 to vector<2x896xf32>
    %18 = arith.select %14, %6, %17 : vector<2x896xi1>, vector<2x896xf32>
    %c0_5 = arith.constant 0 : index
    %c0_6 = arith.constant 0 : index
    %19 = vector.load %arg7[%c0_5, %c0_6] : memref<2x1xf32, #tpu.memory_space<vmem>>, vector<2x1xf32>
    %cst_7 = arith.constant dense<0.000000e+00> : vector<2xf32>
    %20 = vector.multi_reduction <add>, %16, %cst_7 [1] : vector<2x896xf32> to vector<2xf32>
    %21 = vector.shape_cast %20 : vector<2xf32> to vector<2x1xf32>
    %22 = arith.addf %19, %21 : vector<2x1xf32>
    %c0_8 = arith.constant 0 : index
    %c0_9 = arith.constant 0 : index
    %23 = vector.load %arg7[%c0_8, %c0_9] : memref<2x1xf32, #tpu.memory_space<vmem>>, vector<2x1xf32>
    tpu.vector_store %arg7[%c0_8, %c0_9], %22 {strides = array<i32>} : memref<2x1xf32, #tpu.memory_space<vmem>>, vector<2x1xf32>,
    %c0_10 = arith.constant 0 : index
    %c0_11 = arith.constant 0 : index
    %24 = vector.load %arg8[%c0_10, %c0_11] : memref<2x1xf32, #tpu.memory_space<vmem>>, vector<2x1xf32>
    %cst_12 = arith.constant dense<0.000000e+00> : vector<2xf32>
    %25 = vector.multi_reduction <add>, %18, %cst_12 [1] : vector<2x896xf32> to vector<2xf32>
    %26 = vector.shape_cast %25 : vector<2xf32> to vector<2x1xf32>
    %27 = arith.addf %24, %26 : vector<2x1xf32>
    %c0_13 = arith.constant 0 : index
    %c0_14 = arith.constant 0 : index
    %28 = vector.load %arg8[%c0_13, %c0_14] : memref<2x1xf32, #tpu.memory_space<vmem>>, vector<2x1xf32>
    tpu.vector_store %arg8[%c0_13, %c0_14], %27 {strides = array<i32>} : memref<2x1xf32, #tpu.memory_space<vmem>>, vector<2x1xf32>,
    %c0_i32_15 = arith.constant 0 : i32
    %29 = arith.cmpi eq, %arg2, %c0_i32_15 : i32
    %30 = arith.extui %29 : i1 to i32
    %c0_i32_16 = arith.constant 0 : i32
    %31 = arith.cmpi ne, %30, %c0_i32_16 : i32
    scf.if %31 {
      %c0_17 = arith.constant 0 : index
      %c0_18 = arith.constant 0 : index
      %32 = vector.load %arg7[%c0_17, %c0_18] : memref<2x1xf32, #tpu.memory_space<vmem>>, vector<2x1xf32>
      %c0_19 = arith.constant 0 : index
      %c0_20 = arith.constant 0 : index
      %c0_21 = arith.constant 0 : index
      %33 = vector.load %arg5[%c0_19, %c0_20, %c0_21] : memref<1x2x1xf32, #tpu.memory_space<vmem>>, vector<1x2x1xf32>
      %34 = vector.shape_cast %33 : vector<1x2x1xf32> to vector<2x1xf32>
      %35 = vector.shape_cast %32 : vector<2x1xf32> to vector<1x2x1xf32>
      tpu.vector_store %arg5[%c0_19, %c0_20, %c0_21], %35 {strides = array<i32>} : memref<1x2x1xf32, #tpu.memory_space<vmem>>, vector<1x2x1xf32>,
      %c0_22 = arith.constant 0 : index
      %c0_23 = arith.constant 0 : index
      %36 = vector.load %arg8[%c0_22, %c0_23] : memref<2x1xf32, #tpu.memory_space<vmem>>, vector<2x1xf32>
      %c0_24 = arith.constant 0 : index
      %c0_25 = arith.constant 0 : index
      %c0_26 = arith.constant 0 : index
      %37 = vector.load %arg6[%c0_24, %c0_25, %c0_26] : memref<1x2x1xf32, #tpu.memory_space<vmem>>, vector<1x2x1xf32>
      %38 = vector.shape_cast %37 : vector<1x2x1xf32> to vector<2x1xf32>
      %39 = vector.shape_cast %36 : vector<2x1xf32> to vector<1x2x1xf32>
      tpu.vector_store %arg6[%c0_24, %c0_25, %c0_26], %39 {strides = array<i32>} : memref<1x2x1xf32, #tpu.memory_space<vmem>>, vector<1x2x1xf32>,
    } else {
    }
    return
  }
  func.func @transform_0(%arg0: i32, %arg1: i32, %arg2: i32) -> (i32, i32) {
    %c1_i32 = arith.constant 1 : i32
    %0 = arith.muli %arg0, %c1_i32 : i32
    %1 = arith.addi %0, %arg2 : i32
    %c0_i32 = arith.constant 0 : i32
    return %arg1, %1 : i32, i32
  }
  func.func @transform_1(%arg0: i32, %arg1: i32, %arg2: i32) -> (i32, i32) {
    %c1_i32 = arith.constant 1 : i32
    %0 = arith.muli %arg0, %c1_i32 : i32
    %1 = arith.addi %0, %arg2 : i32
    %c0_i32 = arith.constant 0 : i32
    return %arg1, %1 : i32, i32
  }
  func.func @transform_2(%arg0: i32, %arg1: i32, %arg2: i32) -> (i32, i32, i32) {
    %c0_i32 = arith.constant 0 : i32
    %c0_i32_0 = arith.constant 0 : i32
    return %arg0, %arg1, %c0_i32 : i32, i32, i32
  }
  func.func @transform_3(%arg0: i32, %arg1: i32, %arg2: i32) -> (i32, i32, i32) {
    %c0_i32 = arith.constant 0 : i32
    %c0_i32_0 = arith.constant 0 : i32
    return %arg0, %arg1, %c0_i32 : i32, i32, i32
  }
}

</mosaic_0001>

<bundles_post_ra>
// kernel: tpu_custom_call.1
= control target key start
LH: loop header
LB: loop body
LE: loop exit
PB: predicated region body
PF: predicated region fallthrough
CT: control target
= control target key end

     0   :  { %9 = vsyncpa [#allocation5], 0  ;;  %s1071_s0 = inlined_call_operand.hbm [shape: f32[2,1024], index: 0, kind: input, shape index: {}]   ;;  %s1072_s1 = inlined_call_operand.hbm [shape: f32[2,1024], index: 1, kind: input, shape index: {}]   ;;  %s1073_s2 = inlined_call_operand.vmem [shape: f32[2,2,1], index: 2, kind: output, shape index: {0}]   ;;  %s1074_s3 = inlined_call_operand.vmem [shape: f32[2,2,1], index: 3, kind: output, shape index: {1}]  }
   0x1   :  { %11 = vsyncpa [#allocation5 + $0x1], 0 }
   0x2   :  { %12 = vsyncpa [#allocation7], 0 }
   0x3   :  { %14 = vsyncpa [#allocation7 + $0x1], 0  ;;  %s862_s12 = smov 0   ;;  %s864_s13 = smov 0  }
   0x4   :  { %s866_s14 = smov 0   ;;  %s868_s15 = smov 0  }
   0x5   :  { %s870_s16 = smov 0   ;;  %s872_s17 = smov 0  }
   0x6 LB: > { %s650_s18 = sadd.s32 4294967295, %s836_s17   ;;  %s39_s19 = sadd.s32 1, %s832_s16  ;;  %s836_s17 = sphi %s872_s17, %s20_s17   ;;  %s832_s16 = sphi %s870_s16, %s1085_s16   ;;  %s828_s15 = sphi %s868_s15, %s1084_s15   ;;  %s824_s14 = sphi %s866_s14, %s1083_s14   ;;  %s820_s13 = sphi %s864_s13, %s1082_s13   ;;  %s816_s12 = sphi %s862_s12, %s1081_s12  }
   0x7   : > { %p41_p0 = scmp.ge.s32.totalorder %s39_s19, 2  ;;  %s50_s20 = sadd.s32 1, %s824_s14 }
   0x8   : > { %p57_p1 = scmp.ne.s32.totalorder %s824_s14, %s820_s13  ;;  %p58_p2 = scmp.eq.s32.totalorder %s836_s17, 0 }
   0x9   : > { %s1087_s19 = smov (%p41_p0, %s39_s19), 0  ;;  %p63_p4 = scmp.ne.s32.totalorder %s820_s13, %s816_s12 }
   0xa   : > { %p898_p3 = por %p58_p2, %p57_p1  ;;  %s46_s22 = ssub.s32 %s832_s16, %s1087_s19 }
   0xb   : > { %p64_p5 = scmp.eq.s32.totalorder %s650_s18, 0  ;;  %p48_p6 = scmp.eq.s32.totalorder %s46_s22, 0 }
   0xc   : > { %s1077_s21 = scalar_select %p898_p3, 1, 0 }
   0xd   : > { %p905_p7 = por %p64_p5, %p63_p4  ;;  %p653_p8 = scmp.ge.s32.totalorder %s836_s17, 2 }
   0xe   : > { %s910_s24 = scalar_select %p48_p6, %s824_s14, %s50_s20  }
   0xf   : > { %s1078_s23 = scalar_select %p905_p7, 1, 0 }
  0x10   : > { %169 = sbr.rel (%p653_p8) target bundleno = 93 (0x5d), region = 16 }
  0x17   : > { %172 = sbr.rel (!%p898_p3) target bundleno = 57 (0x39), region = 20  ;;  %s173_s25 = sand.u32 (%p898_p3), 1, %s824_s14  }
  0x18   : > { %s179_s26 = smul.u32 (%p898_p3), 7, %s832_s16  ;;  %s920_s4 = scalar_lea.sflag (%p898_p3), [#allocation5], %s173_s25 }
  0x19   : > { %s671_s27 = smul.u32 (%p898_p3), 14, %s173_s25 }
  0x1a   : > { %s180_s28 = ssub.s32 (%p898_p3), 8, %s179_s26 }
  0x1b   : > { %p181_p9 = scmp.lt.s32.totalorder (%p898_p3), %s180_s28, 7  ;;  %s177_s5 = scalar_lea.vmem (%p898_p3), [#allocation4], %s671_s27 }
  0x1e   : > { %s1089_s28 = smov (!%p181_p9, %s180_s28), 7 }
  0x1f   : > { %s917_s29 = sshll.u32 %s1089_s28, 5 }
  0x20   : > { %s185_s30 = ssub.s32 224, %s917_s29 }
  0x21   : > { %186 = vsyncadd %s920_s4, %s185_s30  ;;  %p655_p10 = scmp.ne.s32.totalorder %s917_s29, 0  ;;  %s669_s6 = smul.u32 224, %s832_s16 }
  0x22   : > { %s194_s7 = sshll.u32 %s177_s5, 4  ;;  %s730_s20 = scalar_lea.hbm %s1071_s0, 256  ;;  %s195_s7 = int_to_ptr.vmem [resolvable:$true] %s194_s7 }
  0x23   : > { %s928_s10 = scalar_lea.hbm %s1071_s0, %s669_s6 }
  0x24   : > { %s726_s11 = scalar_lea.hbm %s928_s10, %s917_s29  ;;  %p731_p0 = scmp.lt.u32.totalorder %s928_s10, %s1071_s0 }
  0x25   : > { %p727_p11 = scmp.ne.s32.totalorder %s928_s10, %s726_s11  ;;  %p732_p1 = scmp.lt.u32.totalorder %s730_s20, %s726_s11 }
  0x26   : > { %p734_p4 = scmp.lt.u32.totalorder %s726_s11, %s928_s10 }
  0x27   : > { %p728_p12 = pnand %p727_p11, %p655_p10  ;;  %p733_p2 = por %p732_p1, %p731_p0 }
  0x29   : > { %p729_p13 = pneg %p728_p12  ;;  %p735_p5 = por %p734_p4, %p733_p2 }
  0x2b   : > { %p736_p6 = pnand %p735_p5, %p729_p13 }
  0x2d   : > { %739 = shalt.err (!%p736_p6)
}
  0x2e   : > { %s740_s26 = scalar_lea.vmem %s195_s7, %s917_s29  ;;  %s838_s27 = smov [#allocation4]  }
  0x2f   : > { %p741_p8 = scmp.ne.s32.totalorder %s195_s7, %s740_s26  ;;  %s744_s28 = sshll.u32 %s838_s27, 4  ;;  %s745_s28 = int_to_ptr.vmem [resolvable:$false] %s744_s28 }
  0x30   : > { %s746_s30 = scalar_lea.vmem %s745_s28, 448  ;;  %p747_p12 = scmp.lt.s32.totalorder %s195_s7, %s745_s28 }
  0x31   : > { %p742_p9 = pnand %p741_p8, %p655_p10  ;;  %p748_p7 = scmp.lt.s32.totalorder %s746_s30, %s740_s26 }
  0x33   : > { %p743_p11 = pneg %p742_p9  ;;  %p749_p3 = por %p748_p7, %p747_p12 }
  0x35   : > { %p750_p0 = pnand %p749_p3, %p743_p11 }
  0x37   : > { %753 = shalt.err (!%p750_p0)
}
  0x38   : > { %197 = dma.hbm_to_vmem [thread:$0]  (%p655_p10), %s928_s10, %s917_s29, %s195_s7, %s920_s4  }
  0x39 PF: > { %p1079_p13 = scmp.ne.s32.totalorder %s1077_s21, 0 }
  0x3a   : > { %s201_s5 = sand.u32 (%p1079_p13), 1, %s824_s14   ;;  %s207_s6 = smul.u32 (%p1079_p13), 7, %s832_s16 }
  0x3b   : > { %200 = sbr.rel (!%p1079_p13) target bundleno = 93 (0x5d), region = 24  ;;  %s958_s18 = scalar_lea.sflag (%p1079_p13), [#allocation7], %s201_s5 }
  0x3c   : > { %s672_s8 = smul.u32 (%p1079_p13), 14, %s201_s5  ;;  %s208_s9 = ssub.s32 (%p1079_p13), 8, %s207_s6 }
  0x3d   : > { %p209_p1 = scmp.lt.s32.totalorder (%p1079_p13), %s208_s9, 7 }
  0x3e   : > { %s205_s29 = scalar_lea.vmem (%p1079_p13), [#allocation6], %s672_s8 }
  0x42   : > { %s1091_s9 = smov (!%p209_p1, %s208_s9), 7 }
  0x43   : > { %s955_s11 = sshll.u32 %s1091_s9, 5 }
  0x44   : > { %s213_s12 = ssub.s32 224, %s955_s11 }
  0x45   : > { %214 = vsyncadd %s958_s18, %s213_s12  ;;  %p660_p3 = scmp.ne.s32.totalorder %s955_s11, 0  ;;  %s670_s21 = smul.u32 224, %s832_s16 }
  0x46   : > { %s222_s4 = sshll.u32 %s205_s29, 4  ;;  %s758_s27 = scalar_lea.hbm %s1072_s1, 256  ;;  %s223_s4 = int_to_ptr.vmem [resolvable:$true] %s222_s4 }
  0x47   : > { %s966_s20 = scalar_lea.hbm %s1072_s1, %s670_s21 }
  0x48   : > { %s754_s22 = scalar_lea.hbm %s966_s20, %s955_s11  ;;  %p759_p4 = scmp.lt.u32.totalorder %s966_s20, %s1072_s1 }
  0x49   : > { %p755_p7 = scmp.ne.s32.totalorder %s966_s20, %s754_s22  ;;  %p760_p5 = scmp.lt.u32.totalorder %s758_s27, %s754_s22 }
  0x4a   : > { %p762_p8 = scmp.lt.u32.totalorder %s754_s22, %s966_s20 }
  0x4b   : > { %p756_p10 = pnand %p755_p7, %p660_p3  ;;  %p761_p6 = por %p760_p5, %p759_p4 }
  0x4d   : > { %p757_p2 = pneg %p756_p10  ;;  %p763_p9 = por %p762_p8, %p761_p6 }
  0x4f   : > { %p764_p11 = pnand %p763_p9, %p757_p2 }
  0x51   : > { %767 = shalt.err (!%p764_p11)
}
  0x52   : > { %s768_s5 = scalar_lea.vmem %s223_s4, %s955_s11  ;;  %s839_s6 = smov [#allocation6]  }
  0x53   : > { %p769_p12 = scmp.ne.s32.totalorder %s223_s4, %s768_s5  ;;  %s772_s8 = sshll.u32 %s839_s6, 4  ;;  %s773_s8 = int_to_ptr.vmem [resolvable:$false] %s772_s8 }
  0x54   : > { %s774_s9 = scalar_lea.vmem %s773_s8, 448  ;;  %p775_p1 = scmp.lt.s32.totalorder %s223_s4, %s773_s8 }
  0x55   : > { %p770_p0 = pnand %p769_p12, %p660_p3  ;;  %p776_p7 = scmp.lt.s32.totalorder %s774_s9, %s768_s5 }
  0x57   : > { %p771_p13 = pneg %p770_p0  ;;  %p777_p10 = por %p776_p7, %p775_p1 }
  0x59   : > { %p778_p4 = pnand %p777_p10, %p771_p13 }
  0x5b   : > { %781 = shalt.err (!%p778_p4)
}
  0x5c   : > { %225 = dma.hbm_to_vmem [thread:$0]  (%p660_p3), %s966_s20, %s955_s11, %s223_s4, %s958_s18  }
  0x5d PF: > { %p664_p2 = scmp.ge.s32.totalorder %s836_s17, 1  ;;  %p227_p5 = scmp.lt.s32.totalorder %s836_s17, 3 }
  0x5f   : > { %p228_p6 = pnand %p664_p2, %p227_p5 }
  0x60   : > { %s233_s12 = sand.u32 (!%p228_p6), 1, %s820_s13   ;;  %p1080_p8 = scmp.ne.s32.totalorder (!%p228_p6), %s1078_s23, 0 }
  0x61   : > { %231 = sbr.rel (%p228_p6) target bundleno = 292 (0x124), region = 28  ;;  %s234_s21 = scalar_lea.sflag (!%p228_p6), [#allocation5], %s233_s12 }
  0x62   : > { %s673_s29 = smul.u32 (!%p228_p6), 14, %s233_s12 }
  0x64   : > { %s237_s7 = scalar_lea.vmem (!%p228_p6), [#allocation4], %s673_s29 }
  0x68   : > { %807 = dma.done.wait (%p1080_p8), %s234_s21, 224  }
  0x69   : > { %809 = vsyncadd (%p1080_p8), %s234_s21, 4294967072  ;;  %s243_s11 = scalar_lea.sflag [#allocation7], %s233_s12  ;;  %s246_s18 = scalar_lea.vmem [#allocation6], %s673_s29 }
  0x6a   : > { %811 = dma.done.wait (%p1080_p8), %s243_s11, 224  }
  0x6b   : > { %813 = vsyncadd (%p1080_p8), %s243_s11, 4294967072  ;;  %v324_v0 = vlaneseq  ;;  %s333_s4 = smul.u32 896, %s828_s15  ;;  %v840_v1 = vmov 1983009808   ;;  %vm313_vm0 = vcmask 1024   ;;  %v841_v6 = vmov 0.0  }
  0x6c   : > { %v353_v2 = vunpack.c.l.s4 %v840_v1  ;;  %314 = vst.msk [vmem:[#allocation2] sm:$0x3] %vm313_vm0, %v841_v6  ;;  %315 = vst.msk [vmem:[#allocation3] sm:$0x3] %vm313_vm0, %v841_v6  ;;  %v316_v18 = vld [vmem:[%s237_s7] sm:$0xff]  ;;  %vm448_vm1 = vcmask 1041408  }
  0x6d   : > { %v325_v3 = vand.u32 127, %v324_v0  ;;  %v334_v4 = vstv %s333_s4  ;;  %v356_v5 = vshrl.u32 %v324_v0, 7  ;;  %v317_v19 = vld [vmem:[%s237_s7 + $0x8] sm:$0x3f]  ;;  %v318_v20 = vld [vmem:[%s246_s18] sm:$0xff]  ;;  %p295_p3 = scmp.lt.s32.totalorder %s828_s15, 1 }
  0x6e   : > { %v354_v7 = vunpack.c.0.s8 %v353_v2  ;;  %v319_v23 = vld [vmem:[%s246_s18 + $0x8] sm:$0x3f]  ;;  %v320_v24 = vmul.f32 %v318_v20, %v316_v18  ;;  %v322_v31 = vadd.f32 %v318_v20, %v316_v18 }
  0x6f   : > { %v326_v8 = vadd.s32 128, %v325_v3  ;;  %v327_v9 = vadd.s32 256, %v325_v3  ;;  %v328_v10 = vadd.s32 384, %v325_v3  ;;  %v329_v11 = vadd.s32 512, %v325_v3  ;;  %s1093_s15 = smov (!%p295_p3, %s828_s15), 1 }
  0x70   : > { %v330_v12 = vadd.s32 640, %v325_v3  ;;  %v331_v13 = vadd.s32 768, %v325_v3  ;;  %v335_v14 = vadd.s32 %v334_v4, %v325_v3  ;;  %v1003_v17 = vsub.s32 %v354_v7, %v356_v5  ;;  %s665_s23 = sshll.u32 %s1093_s15, 1 }
  0x71   : > { %v336_v15 = vadd.s32 %v334_v4, %v326_v8  ;;  %v337_v16 = vadd.s32 %v334_v4, %v327_v9  ;;  %v338_v21 = vadd.s32 %v334_v4, %v328_v10  ;;  %v339_v22 = vadd.s32 %v334_v4, %v329_v11  ;;  %s301_s22 = scalar_lea.vmem %s1073_s2, %s665_s23  ;;  %s308_s27 = scalar_lea.vmem %s1074_s3, %s665_s23 }
  0x72   : > { %v321_v25 = vmul.f32 %v319_v23, %v317_v19  ;;  %v340_v26 = vadd.s32 %v334_v4, %v330_v12  ;;  %v341_v27 = vadd.s32 %v334_v4, %v331_v13  ;;  %vm342_vm2 = vcmp.lt.s32.totalorder %v335_v14, 1024 }
  0x73   : > { %vm343_vm3 = vcmp.lt.s32.totalorder %v336_v15, 1024  ;;  %vm344_vm4 = vcmp.lt.s32.totalorder %v337_v16, 1024  ;;  %v351_v28 = vcombine.high %v320_v24, %v320_v24  ;;  %v358_v29 = vrot.slane %v320_v24, %v1003_v17  ;;  %v447_v24 = vld [vmem:[#allocation2] sm:$0x3] }
  0x74   : > { %vm345_vm5 = vcmp.lt.s32.totalorder %v338_v21, 1024  ;;  %vm346_vm6 = vcmp.lt.s32.totalorder %v339_v22, 1024  ;;  %v375_v30 = vrot.slane %v321_v25, %v1003_v17  ;;  %v368_v34 = vcombine.high %v321_v25, %v321_v25 }
  0x75   : > { %v365_v32 = vrot.slane %v351_v28, %v1003_v17  ;;  %v366_v33 = vcombine.high %v358_v29, %v358_v29  ;;  %v391_v35 = vsel %vm342_vm2, %v358_v29, 0.0  ;;  %vm347_vm7 = vcmp.lt.s32.totalorder %v340_v26, 1024 }
  0x76   : > { %v383_v36 = vcombine.high %v375_v30, %v375_v30  ;;  %v449_v37 = vsel %vm448_vm1, %v391_v35, 0.0  ;;  %v400_v38 = vcombine.high %v322_v31, %v322_v31  ;;  %v323_v42 = vadd.f32 %v319_v23, %v317_v19 }
  0x77   : > { %v367_v39 = vcombine.high %v365_v32, %v365_v32  ;;  %v392_v40 = vsel %vm343_vm3, %v366_v33, 0.0  ;;  %v393_v41 = vsel %vm344_vm4, %v365_v32, 0.0  ;;  %v395_v43 = vsel %vm346_vm6, %v375_v30, 0.0 }
  0x78   : > { %v450_v44 = vsel %vm448_vm1, %v392_v40, 0.0  ;;  %v452_v45 = vsel %vm448_vm1, %v393_v41, 0.0  ;;  %vm348_vm8 = vcmp.lt.s32.totalorder %v341_v27, 1024  ;;  %v382_v46 = vrot.slane %v368_v34, %v1003_v17  ;;  %v467_v27 = vld [vmem:[#allocation3] sm:$0x3] }
  0x79   : > { %v394_v47 = vsel %vm345_vm5, %v367_v39, 0.0  ;;  %v451_v48 = vadd.f32 %v450_v44, %v449_v37  ;;  %v396_v49 = vsel %vm347_vm7, %v383_v36, 0.0  ;;  %v407_v51 = vrot.slane %v322_v31, %v1003_v17 }
  0x7a   : > { %v454_v50 = vsel %vm448_vm1, %v394_v47, 0.0  ;;  %v414_v52 = vrot.slane %v400_v38, %v1003_v17  ;;  %v456_v54 = vsel %vm448_vm1, %v395_v43, 0.0  ;;  %v424_v55 = vrot.slane %v323_v42, %v1003_v17 }
  0x7b   : > { %v453_v53 = vadd.f32 %v452_v45, %v451_v48  ;;  %v415_v56 = vcombine.high %v407_v51, %v407_v51  ;;  %v417_v58 = vcombine.high %v323_v42, %v323_v42  ;;  %v440_v59 = vsel %vm342_vm2, %v407_v51, 0.0 }
  0x7c   : > { %v416_v57 = vcombine.high %v414_v52, %v414_v52  ;;  %v397_v60 = vsel %vm348_vm8, %v382_v46, 0.0  ;;  %v458_v62 = vsel %vm448_vm1, %v396_v49, 0.0  ;;  %v442_v63 = vsel %vm344_vm4, %v414_v52, 0.0 }
  0x7d   : > { %v455_v61 = vadd.f32 %v454_v50, %v453_v53  ;;  %v432_v0 = vcombine.high %v424_v55, %v424_v55  ;;  %v441_v1 = vsel %vm343_vm3, %v415_v56, 0.0  ;;  %v468_v3 = vsel %vm448_vm1, %v440_v59, 0.0 }
  0x7e   : > { %v443_v2 = vsel %vm345_vm5, %v416_v57, 0.0  ;;  %v469_v5 = vsel %vm448_vm1, %v441_v1, 0.0  ;;  %v471_v6 = vsel %vm448_vm1, %v442_v63, 0.0  ;;  %v460_v7 = vsel %vm448_vm1, %v397_v60, 0.0 }
  0x7f   : > { %v457_v4 = vadd.f32 %v456_v54, %v455_v61  ;;  %v431_v8 = vrot.slane %v417_v58, %v1003_v17  ;;  %v444_v9 = vsel %vm346_vm6, %v424_v55, 0.0  ;;  %v470_v10 = vadd.f32 %v469_v5, %v468_v3 }
  0x80   : > { %v473_v12 = vsel %vm448_vm1, %v443_v2, 0.0  ;;  %v445_v13 = vsel %vm347_vm7, %v432_v0, 0.0  ;;  %v475_v16 = vsel %vm448_vm1, %v444_v9, 0.0 }
  0x81   : > { %v459_v11 = vadd.f32 %v458_v62, %v457_v4  ;;  %v472_v14 = vadd.f32 %v471_v6, %v470_v10  ;;  %v446_v18 = vsel %vm348_vm8, %v431_v8, 0.0  ;;  %v477_v17 = vsel %vm448_vm1, %v445_v13, 0.0 }
  0x82   : > { %v479_v21 = vsel %vm448_vm1, %v446_v18, 0.0 }
  0x83   : > { %v461_v15 = vadd.f32 %v460_v7, %v459_v11  ;;  %v474_v19 = vadd.f32 %v473_v12, %v472_v14 }
  0x85   : > { %462 = vadd.xlane.f32.xlu0 %v461_v15  ;;  %v476_v20 = vadd.f32 %v475_v16, %v474_v19 }
  0x87   : > { %v478_v22 = vadd.f32 %v477_v17, %v476_v20 }
  0x89   : > { %v480_v23 = vadd.f32 %v479_v21, %v478_v22 }
  0x8b   : > { %481 = vadd.xlane.f32.xlu0 %v480_v23 }
 0x112   : > { %v463_v25 = vpop.xlane.xlu0 %462 }
 0x113   : > { %v464_v26 = vadd.f32 %v463_v25, %v447_v24 }
 0x115   : > { %466 = vst.msk [vmem:[#allocation2] sm:$0x3] %vm313_vm0, %v464_v26 }
 0x118   : > { %v482_v28 = vpop.xlane.xlu0 %481 }
 0x119   : > { %v483_v29 = vadd.f32 %v482_v28, %v467_v27 }
 0x11b   : > { %484 = vst.msk [vmem:[#allocation3] sm:$0x3] %vm313_vm0, %v483_v29 }
 0x11c   : > { %v488_v30 = vld [vmem:[#allocation2] sm:$0x3] }
 0x11d   : > { %489 = vst.msk [vmem:[%s301_s22] sm:$0x3] %vm313_vm0, %v488_v30 }
 0x122   : > { %v490_v31 = vld [vmem:[#allocation3] sm:$0x3] }
 0x123   : > { %491 = vst.msk [vmem:[%s308_s27] sm:$0x3] %vm313_vm0, %v490_v31 }
 0x124 PF: > { %s20_s17 = sadd.s32 1, %s836_s17   ;;  %s1081_s12 = smov %s820_s13 }
 0x125   : > { %p17_p9 = scmp.ge.s32.totalorder %s20_s17, 4   ;;  %s1082_s13 = smov %s824_s14 }
 0x126   : > { %s1083_s14 = smov %s910_s24  ;;  %s1084_s15 = smov %s832_s16 }
 0x127   : > { %s1085_s16 = smov %s1087_s19  ;;  %19 = sbr.rel (!%p17_p9) target bundleno = 6 (0x6), region = 101 }
 0x12e   :  { %537 = vsyncpa [#allocation5], 1 }
 0x12f   :  { %539 = vsyncpa [#allocation5 + $0x1], 1 }
 0x130   :  { %540 = vsyncpa [#allocation7], 1 }
 0x131   :  { %542 = vsyncpa [#allocation7 + $0x1], 1 }

</bundles_post_ra>
